<compile_context>
chip_gen: v6e
topology: v6e:2x2x1
jax: 0.10.0
libtpu: 0.0.40
codegen_flags: <defaults>
</compile_context>

<pallas_src>
import jax
import jax.numpy as jnp
from jax import lax
from jax.experimental import pallas as pl
from jax.experimental.pallas import tpu as pltpu

# ---------------- model hyperparameters (match the PyTorch __init__) ----------
DOMAIN_EMB_DIM = 16
USER_EMB_DIM = 24
TITLE_EMB_DIM = 200
NUMERICAL_DIM = 36
HIDDEN_DIM = 128
HIDDEN2_DIM = HIDDEN_DIM // 2
TOTAL_INPUT_DIM = TITLE_EMB_DIM + NUMERICAL_DIM + DOMAIN_EMB_DIM + USER_EMB_DIM  # 276


def _round_up(x, m):
    return ((x + m - 1) // m) * m


# ---------------- Pallas kernels ----------------------------------------------
def mlp_kernel_fused(t_ref, n_ref, did_ref, uid_ref,
                     w1t_ref, w1n_ref, w1d_lut_ref, w1u_lut_ref, b1_ref,
                     w2_ref, b2_ref, w3_ref, b3_ref, o_ref):
    """Fused 3-layer MLP with in-kernel embedding lookup.

    Layer 1 == concat([title*0.5, num, dom_emb, usr_emb]) @ W1, computed as the
    sum of partial matmuls; the embedding segments use one_hot(id) @ LUT where
    LUT = table @ W1_segment was precomputed at weight-prep time.
    """
    cdt = w1t_ref.dtype  # MXU compute dtype (bf16)

    h1 = jnp.dot(t_ref[...].astype(cdt), w1t_ref[...],
                 preferred_element_type=jnp.float32)
    h1 = h1 + jnp.dot(n_ref[...].astype(cdt), w1n_ref[...],
                      preferred_element_type=jnp.float32)

    n_dom = w1d_lut_ref.shape[0]
    d_onehot = jnp.where(
        did_ref[...] == lax.broadcasted_iota(jnp.int32, (1, n_dom), 1),
        1.0, 0.0).astype(cdt)                                   # (bm, n_dom)
    h1 = h1 + jnp.dot(d_onehot, w1d_lut_ref[...],
                      preferred_element_type=jnp.float32)

    n_usr = w1u_lut_ref.shape[0]
    u_onehot = jnp.where(
        uid_ref[...] == lax.broadcasted_iota(jnp.int32, (1, n_usr), 1),
        1.0, 0.0).astype(cdt)                                   # (bm, n_usr)
    h1 = h1 + jnp.dot(u_onehot, w1u_lut_ref[...],
                      preferred_element_type=jnp.float32)

    h1 = jnp.maximum(h1 + b1_ref[...], 0.0)                     # (bm, 128) f32

    h2 = jnp.dot(h1.astype(cdt), w2_ref[...],
                 preferred_element_type=jnp.float32) + b2_ref[...]
    h2 = jnp.maximum(h2, 0.0)                                    # (bm, 64) f32

    # Layer 3 (N=1): VPU multiply + lane reduction instead of an MXU push.
    out = jnp.sum(h2 * w3_ref[...], axis=-1, keepdims=True) + b3_ref[...]
    o_ref[...] = out.astype(o_ref.dtype)                         # (bm, 1)


def mlp_kernel_segments(t_ref, n_ref, d_ref, u_ref,
                        w1t_ref, w1n_ref, w1d_ref, w1u_ref, b1_ref,
                        w2_ref, b2_ref, w3_ref, b3_ref, o_ref):
    """Fallback for huge vocabularies: embeddings gathered outside (bf16)."""
    cdt = w1t_ref.dtype

    h1 = jnp.dot(t_ref[...].astype(cdt), w1t_ref[...],
                 preferred_element_type=jnp.float32)
    h1 = h1 + jnp.dot(n_ref[...].astype(cdt), w1n_ref[...],
                      preferred_element_type=jnp.float32)
    h1 = h1 + jnp.dot(d_ref[...].astype(cdt), w1d_ref[...],
                      preferred_element_type=jnp.float32)
    h1 = h1 + jnp.dot(u_ref[...].astype(cdt), w1u_ref[...],
                      preferred_element_type=jnp.float32)
    h1 = jnp.maximum(h1 + b1_ref[...], 0.0)

    h2 = jnp.dot(h1.astype(cdt), w2_ref[...],
                 preferred_element_type=jnp.float32) + b2_ref[...]
    h2 = jnp.maximum(h2, 0.0)

    out = jnp.sum(h2 * w3_ref[...], axis=-1, keepdims=True) + b3_ref[...]
    o_ref[...] = out.astype(o_ref.dtype)


# ---------------- shared pallas_call wrapper -----------------------------------
def _mlp_pallas_call(kernel, batch_arrays, const_arrays, *,
                     bm=2048, num_cores=1, vmem_limit_bytes=None):
    """Batch-tiled, bandwidth-oriented pallas_call around one of the kernels.

    bm:            batch tile (rows).  2048 ~ 2.3 MB of f32 input / step, which
                    amortizes the ~0.35 us per-grid-step overhead and still fits
                    double-buffered in every generation's scoped VMEM default.
                    On v5e with f32 inputs keep bm <= ~4096 or raise
                    vmem_limit_bytes (default scoped limit there is 16 MiB).
    num_cores:     set to 2 on v7x so the 1-D "parallel" grid has work for both
                    TensorCores; leave 1 on single-TC v5e/v6e.
    """
    B = batch_arrays[0].shape[0]
    bm_eff = max(8, min(bm, _round_up(B, 8)))
    if num_cores > 1:
        bm_eff = max(8, min(bm_eff, _round_up(pl.cdiv(B, num_cores), 8)))
    grid = (pl.cdiv(B, bm_eff),)   # ragged B handled by partial last tile

    in_specs = (
        [pl.BlockSpec((bm_eff, a.shape[1]), lambda i: (i, 0)) for a in batch_arrays]
        + [pl.BlockSpec(a.shape, lambda i: (0, 0)) for a in const_arrays])

    out = pl.pallas_call(
        kernel,
        out_shape=jax.ShapeDtypeStruct((B, 1), jnp.float32),
        grid_spec=pltpu.PrefetchScalarGridSpec(
            num_scalar_prefetch=0,
            grid=grid,
            in_specs=in_specs,
            out_specs=pl.BlockSpec((bm_eff, 1), lambda i: (i, 0)),
        ),
        compiler_params=pltpu.CompilerParams(
            dimension_semantics=("parallel",),
            vmem_limit_bytes=vmem_limit_bytes,
        ),
    )(*batch_arrays, *const_arrays)
    return out[:, 0]   # (B,)


# ---------------- parameter construction (matches _init_weights) --------------
def init_params(key, n_domains, n_users):
    keys = jax.random.split(key, 5)
    # nn.init.normal_(embedding.weight, 0, 0.01)
    domain_table = 0.01 * jax.random.normal(keys[0], (n_domains, DOMAIN_EMB_DIM), jnp.float32)
    user_table = 0.01 * jax.random.normal(keys[1], (n_users, USER_EMB_DIM), jnp.float32)
    # kaiming_normal_(mode='fan_out', nonlinearity='relu') -> std = sqrt(2 / out_features)
    # PyTorch Linear weight is (out, in); we store the transposed (in, out) for x @ W.
    std1 = (2.0 / HIDDEN_DIM) ** 0.5
    std2 = (2.0 / HIDDEN2_DIM) ** 0.5
    std3 = (2.0 / 1) ** 0.5
    w1 = std1 * jax.random.normal(keys[2], (TOTAL_INPUT_DIM, HIDDEN_DIM), jnp.float32)
    w2 = std2 * jax.random.normal(keys[3], (HIDDEN_DIM, HIDDEN2_DIM), jnp.float32)
    w3 = std3 * jax.random.normal(keys[4], (HIDDEN2_DIM, 1), jnp.float32)
    b1 = jnp.zeros((1, HIDDEN_DIM), jnp.float32)
    b2 = jnp.zeros((1, HIDDEN2_DIM), jnp.float32)
    b3 = jnp.zeros((1, 1), jnp.float32)
    return dict(domain_table=domain_table, user_table=user_table,
                w1=w1, b1=b1, w2=w2, b2=b2, w3=w3, b3=b3)


def prepare_inference_weights(params, compute_dtype=jnp.bfloat16,
                              max_fused_vocab_rows=4096):
    """One-time prep: split W1 by input segment, fold the 0.5 title scale into
    its rows, cast MXU operands to bf16.  If the embedding vocabularies are
    small enough, fold the embedding lookups into layer-1 LUTs
    (table @ W1_segment) so the kernel can do the lookup itself via a one-hot
    matmul; otherwise store bf16 tables for the XLA-gather fallback."""
    w1 = params["w1"]
    o1 = TITLE_EMB_DIM
    o2 = o1 + NUMERICAL_DIM
    o3 = o2 + DOMAIN_EMB_DIM
    o4 = o3 + USER_EMB_DIM
    w1t = (w1[:o1] * 0.5).astype(compute_dtype)      # 0.5 title scale folded in
    w1n = w1[o1:o2].astype(compute_dtype)
    w1d_f32 = w1[o2:o3]
    w1u_f32 = w1[o3:o4]

    dom_tab = params["domain_table"]
    usr_tab = params["user_table"]
    n_dom, n_usr = dom_tab.shape[0], usr_tab.shape[0]
    n_dom_pad, n_usr_pad = _round_up(n_dom, 8), _round_up(n_usr, 8)
    fused = (n_dom_pad + n_usr_pad) <= max_fused_vocab_rows

    kw = dict(
        fused_embedding=fused,
        w1t=w1t, w1n=w1n, b1=params["b1"],
        w2=params["w2"].astype(compute_dtype), b2=params["b2"],
        w3_row=params["w3"].reshape(1, HIDDEN2_DIM),   # (1, 64) f32 for VPU reduce
        b3=params["b3"],
    )
    if fused:
        # LUT = embedding_table @ W1_segment, padded to a sublane multiple.
        w1d_lut = jnp.pad(dom_tab @ w1d_f32, ((0, n_dom_pad - n_dom), (0, 0)))
        w1u_lut = jnp.pad(usr_tab @ w1u_f32, ((0, n_usr_pad - n_usr), (0, 0)))
        kw.update(w1d_lut=w1d_lut.astype(compute_dtype),
                  w1u_lut=w1u_lut.astype(compute_dtype))
    else:
        kw.update(w1d=w1d_f32.astype(compute_dtype),
                  w1u=w1u_f32.astype(compute_dtype),
                  domain_table=dom_tab.astype(compute_dtype),
                  user_table=usr_tab.astype(compute_dtype))
    return kw


# ---------------- full forward --------------------------------------------------
def combined_score_predictor_forward(kw, title_emb, numerical_features,
                                     domain_ids, user_ids, *,
                                     bm=2048, num_cores=1, vmem_limit_bytes=None):
    B = title_emb.shape[0]
    assert title_emb.shape == (B, TITLE_EMB_DIM)
    assert numerical_features.shape == (B, NUMERICAL_DIM)
    call_kwargs = dict(bm=bm, num_cores=num_cores, vmem_limit_bytes=vmem_limit_bytes)

    if kw["fused_embedding"]:
        did = domain_ids.reshape(B, 1).astype(jnp.int32)
        uid = user_ids.reshape(B, 1).astype(jnp.int32)
        return _mlp_pallas_call(
            mlp_kernel_fused,
            [title_emb, numerical_features, did, uid],
            [kw["w1t"], kw["w1n"], kw["w1d_lut"], kw["w1u_lut"], kw["b1"],
             kw["w2"], kw["b2"], kw["w3_row"], kw["b3"]],
            **call_kwargs)

    # Fallback (huge vocab): XLA gather of bf16 tables, segment-matmul kernel.
    dom_emb = jnp.take(kw["domain_table"], domain_ids, axis=0)   # (B, 16) bf16
    usr_emb = jnp.take(kw["user_table"], user_ids, axis=0)       # (B, 24) bf16
    return _mlp_pallas_call(
        mlp_kernel_segments,
        [title_emb, numerical_features, dom_emb, usr_emb],
        [kw["w1t"], kw["w1n"], kw["w1d"], kw["w1u"], kw["b1"],
         kw["w2"], kw["b2"], kw["w3_row"], kw["b3"]],
        **call_kwargs)


# ---------------- references -----------------------------------------------------
def reference_forward_f32(params, title_emb, numerical_features, domain_ids, user_ids):
    """Pure-f32 reference matching the PyTorch eval-mode forward exactly."""
    dom = jnp.take(params["domain_table"], domain_ids, axis=0)
    usr = jnp.take(params["user_table"], user_ids, axis=0)
    x = jnp.concatenate([title_emb * 0.5, numerical_features, dom, usr], axis=1)
    h1 = jnp.maximum(x @ params["w1"] + params["b1"], 0.0)
    h2 = jnp.maximum(h1 @ params["w2"] + params["b2"], 0.0)
    return (h2 @ params["w3"] + params["b3"])[:, 0]


def reference_forward_matched(kw, title_emb, numerical_features, domain_ids, user_ids):
    """Reference using the same bf16-rounded weights / precision path as the kernel."""
    cdt = kw["w1t"].dtype
    h1 = jnp.dot(title_emb.astype(cdt), kw["w1t"], preferred_element_type=jnp.float32)
    h1 = h1 + jnp.dot(numerical_features.astype(cdt), kw["w1n"],
                      preferred_element_type=jnp.float32)
    if kw["fused_embedding"]:
        # one_hot(id) @ LUT with f32 accumulation is an exact row-select.
        h1 = h1 + jnp.take(kw["w1d_lut"], domain_ids, axis=0).astype(jnp.float32)
        h1 = h1 + jnp.take(kw["w1u_lut"], user_ids, axis=0).astype(jnp.float32)
    else:
        dom = jnp.take(kw["domain_table"], domain_ids, axis=0)
        usr = jnp.take(kw["user_table"], user_ids, axis=0)
        h1 = h1 + jnp.dot(dom.astype(cdt), kw["w1d"], preferred_element_type=jnp.float32)
        h1 = h1 + jnp.dot(usr.astype(cdt), kw["w1u"], preferred_element_type=jnp.float32)
    h1 = jnp.maximum(h1 + kw["b1"], 0.0)
    h2 = jnp.maximum(jnp.dot(h1.astype(cdt), kw["w2"],
                             preferred_element_type=jnp.float32) + kw["b2"], 0.0)
    return (jnp.sum(h2 * kw["w3_row"], axis=-1, keepdims=True) + kw["b3"])[:, 0]


if __name__ == "__main__":
    n_domains, n_users = 10, 20
    B = 13  # deliberately ragged: exercises the no-pad partial-tile path

    root = jax.random.PRNGKey(0)
    k_params, k_title, k_num, k_dom, k_usr = jax.random.split(root, 5)

    params = init_params(k_params, n_domains, n_users)

    title_emb = jax.random.normal(k_title, (B, TITLE_EMB_DIM), jnp.float32)
    numerical_features = jax.random.normal(k_num, (B, NUMERICAL_DIM), jnp.float32)
    domain_ids = jax.random.randint(k_dom, (B,), 0, n_domains, jnp.int32)
    user_ids = jax.random.randint(k_usr, (B,), 0, n_users, jnp.int32)

    ref_f32 = reference_forward_f32(params, title_emb, numerical_features,
                                    domain_ids, user_ids)

    # ---- Path 1: fused in-kernel embedding lookup (small vocab) ----
    kw_fused = prepare_inference_weights(params)
    out = combined_score_predictor_forward(kw_fused, title_emb, numerical_features,
                                           domain_ids, user_ids)
    out = jax.block_until_ready(out)
    assert out.shape == (B,)
    ref_m = reference_forward_matched(kw_fused, title_emb, numerical_features,
                                      domain_ids, user_ids)
    assert jnp.allclose(out, ref_m, atol=2e-3, rtol=2e-3), \
        "fused kernel mismatch vs precision-matched reference"
    assert jnp.allclose(out, ref_f32, atol=0.5, rtol=0.05), \
        "fused kernel mismatch vs f32 reference beyond bf16 tolerance"

    # ---- Path 2: forced fallback (large-vocab path: XLA gather + segment kernel) ----
    kw_fb = prepare_inference_weights(params, max_fused_vocab_rows=0)
    out_fb = combined_score_predictor_forward(kw_fb, title_emb, numerical_features,
                                              domain_ids, user_ids)
    out_fb = jax.block_until_ready(out_fb)
    assert out_fb.shape == (B,)
    ref_m_fb = reference_forward_matched(kw_fb, title_emb, numerical_features,
                                         domain_ids, user_ids)
    assert jnp.allclose(out_fb, ref_m_fb, atol=2e-3, rtol=2e-3), \
        "fallback kernel mismatch vs precision-matched reference"
    assert jnp.allclose(out_fb, ref_f32, atol=0.5, rtol=0.05), \
        "fallback kernel mismatch vs f32 reference beyond bf16 tolerance"

    print("KERNEL_OK")
</pallas_src>

<mosaic_0001>
module attributes {stable_mosaic.version = 11 : i64} {
  func.func @mlp_kernel_fused(%arg0: i32, %arg1: memref<16x200xf32, #tpu.memory_space<vmem>>, %arg2: memref<16x36xf32, #tpu.memory_space<vmem>>, %arg3: memref<16x1xi32, #tpu.memory_space<vmem>>, %arg4: memref<16x1xi32, #tpu.memory_space<vmem>>, %arg5: memref<200x128xbf16, #tpu.memory_space<vmem>>, %arg6: memref<36x128xbf16, #tpu.memory_space<vmem>>, %arg7: memref<16x128xbf16, #tpu.memory_space<vmem>>, %arg8: memref<24x128xbf16, #tpu.memory_space<vmem>>, %arg9: memref<1x128xf32, #tpu.memory_space<vmem>>, %arg10: memref<128x64xbf16, #tpu.memory_space<vmem>>, %arg11: memref<1x64xf32, #tpu.memory_space<vmem>>, %arg12: memref<1x64xf32, #tpu.memory_space<vmem>>, %arg13: memref<1x1xf32, #tpu.memory_space<vmem>>, %arg14: memref<16x1xf32, #tpu.memory_space<vmem>>) attributes {dimension_semantics = [#tpu.dimension_semantics<parallel>], iteration_bounds = array<i64: 1>, scalar_prefetch = 0 : i64, scratch_operands = 0 : i64, tpu.core_type = #tpu.core_type<tc>, window_params = [{transform_indices = @transform_0, window_bounds = array<i64: 16, 200>}, {transform_indices = @transform_1, window_bounds = array<i64: 16, 36>}, {transform_indices = @transform_2, window_bounds = array<i64: 16, 1>}, {transform_indices = @transform_3, window_bounds = array<i64: 16, 1>}, {pipeline_mode = #tpu.pipeline_mode<synchronous>, transform_indices = @transform_4, window_bounds = array<i64: 200, 128>}, {pipeline_mode = #tpu.pipeline_mode<synchronous>, transform_indices = @transform_5, window_bounds = array<i64: 36, 128>}, {pipeline_mode = #tpu.pipeline_mode<synchronous>, transform_indices = @transform_6, window_bounds = array<i64: 16, 128>}, {pipeline_mode = #tpu.pipeline_mode<synchronous>, transform_indices = @transform_7, window_bounds = array<i64: 24, 128>}, {pipeline_mode = #tpu.pipeline_mode<synchronous>, transform_indices = @transform_8, window_bounds = array<i64: 1, 128>}, {pipeline_mode = #tpu.pipeline_mode<synchronous>, transform_indices = @transform_9, window_bounds = array<i64: 128, 64>}, {pipeline_mode = #tpu.pipeline_mode<synchronous>, transform_indices = @transform_10, window_bounds = array<i64: 1, 64>}, {pipeline_mode = #tpu.pipeline_mode<synchronous>, transform_indices = @transform_11, window_bounds = array<i64: 1, 64>}, {pipeline_mode = #tpu.pipeline_mode<synchronous>, transform_indices = @transform_12, window_bounds = array<i64: 1, 1>}, {transform_indices = @transform_13, window_bounds = array<i64: 16, 1>}]} {
    %c0 = arith.constant 0 : index
    %c0_0 = arith.constant 0 : index
    %0 = vector.load %arg1[%c0, %c0_0] : memref<16x200xf32, #tpu.memory_space<vmem>>, vector<16x200xf32>
    %1 = arith.truncf %0 : vector<16x200xf32> to vector<16x200xbf16>
    %c0_1 = arith.constant 0 : index
    %c0_2 = arith.constant 0 : index
    %2 = vector.load %arg5[%c0_1, %c0_2] : memref<200x128xbf16, #tpu.memory_space<vmem>>, vector<200x128xbf16>
    %cst = arith.constant dense<0.000000e+00> : vector<16x128xf32>
    %3 = tpu.matmul %1, %2, %cst {dimension_numbers = #tpu.dot_dimension_numbers<[1], [0], [0], [1], [0, 0, 1, 1], [], []>} : vector<16x200xbf16>, vector<200x128xbf16>, vector<16x128xf32> -> vector<16x128xf32>
    %c0_3 = arith.constant 0 : index
    %c0_4 = arith.constant 0 : index
    %4 = vector.load %arg2[%c0_3, %c0_4] : memref<16x36xf32, #tpu.memory_space<vmem>>, vector<16x36xf32>
    %5 = arith.truncf %4 : vector<16x36xf32> to vector<16x36xbf16>
    %c0_5 = arith.constant 0 : index
    %c0_6 = arith.constant 0 : index
    %6 = vector.load %arg6[%c0_5, %c0_6] : memref<36x128xbf16, #tpu.memory_space<vmem>>, vector<36x128xbf16>
    %cst_7 = arith.constant dense<0.000000e+00> : vector<16x128xf32>
    %7 = tpu.matmul %5, %6, %cst_7 {dimension_numbers = #tpu.dot_dimension_numbers<[1], [0], [0], [1], [0, 0, 1, 1], [], []>} : vector<16x36xbf16>, vector<36x128xbf16>, vector<16x128xf32> -> vector<16x128xf32>
    %8 = arith.addf %3, %7 : vector<16x128xf32>
    %c0_8 = arith.constant 0 : index
    %c0_9 = arith.constant 0 : index
    %9 = vector.load %arg3[%c0_8, %c0_9] : memref<16x1xi32, #tpu.memory_space<vmem>>, vector<16x1xi32>
    %10 = tpu.iota {dimensions = array<i32: 1>} : vector<1x16xi32>
    %11 = vector.broadcast %9 : vector<16x1xi32> to vector<16x16xi32>
    %12 = vector.broadcast %10 : vector<1x16xi32> to vector<16x16xi32>
    %13 = arith.cmpi eq, %11, %12 : vector<16x16xi32>
    %cst_10 = arith.constant 1.000000e+00 : f32
    %cst_11 = arith.constant 0.000000e+00 : f32
    %14 = vector.broadcast %cst_10 : f32 to vector<16x16xf32>
    %15 = vector.broadcast %cst_11 : f32 to vector<16x16xf32>
    %16 = arith.select %13, %14, %15 : vector<16x16xi1>, vector<16x16xf32>
    %17 = arith.truncf %16 : vector<16x16xf32> to vector<16x16xbf16>
    %c0_12 = arith.constant 0 : index
    %c0_13 = arith.constant 0 : index
    %18 = vector.load %arg7[%c0_12, %c0_13] : memref<16x128xbf16, #tpu.memory_space<vmem>>, vector<16x128xbf16>
    %cst_14 = arith.constant dense<0.000000e+00> : vector<16x128xf32>
    %19 = tpu.matmul %17, %18, %cst_14 {dimension_numbers = #tpu.dot_dimension_numbers<[1], [0], [0], [1], [0, 0, 1, 1], [], []>} : vector<16x16xbf16>, vector<16x128xbf16>, vector<16x128xf32> -> vector<16x128xf32>
    %20 = arith.addf %8, %19 : vector<16x128xf32>
    %c0_15 = arith.constant 0 : index
    %c0_16 = arith.constant 0 : index
    %21 = vector.load %arg4[%c0_15, %c0_16] : memref<16x1xi32, #tpu.memory_space<vmem>>, vector<16x1xi32>
    %22 = tpu.iota {dimensions = array<i32: 1>} : vector<1x24xi32>
    %23 = vector.broadcast %21 : vector<16x1xi32> to vector<16x24xi32>
    %24 = vector.broadcast %22 : vector<1x24xi32> to vector<16x24xi32>
    %25 = arith.cmpi eq, %23, %24 : vector<16x24xi32>
    %cst_17 = arith.constant 1.000000e+00 : f32
    %cst_18 = arith.constant 0.000000e+00 : f32
    %26 = vector.broadcast %cst_17 : f32 to vector<16x24xf32>
    %27 = vector.broadcast %cst_18 : f32 to vector<16x24xf32>
    %28 = arith.select %25, %26, %27 : vector<16x24xi1>, vector<16x24xf32>
    %29 = arith.truncf %28 : vector<16x24xf32> to vector<16x24xbf16>
    %c0_19 = arith.constant 0 : index
    %c0_20 = arith.constant 0 : index
    %30 = vector.load %arg8[%c0_19, %c0_20] : memref<24x128xbf16, #tpu.memory_space<vmem>>, vector<24x128xbf16>
    %cst_21 = arith.constant dense<0.000000e+00> : vector<16x128xf32>
    %31 = tpu.matmul %29, %30, %cst_21 {dimension_numbers = #tpu.dot_dimension_numbers<[1], [0], [0], [1], [0, 0, 1, 1], [], []>} : vector<16x24xbf16>, vector<24x128xbf16>, vector<16x128xf32> -> vector<16x128xf32>
    %32 = arith.addf %20, %31 : vector<16x128xf32>
    %c0_22 = arith.constant 0 : index
    %c0_23 = arith.constant 0 : index
    %33 = vector.load %arg9[%c0_22, %c0_23] : memref<1x128xf32, #tpu.memory_space<vmem>>, vector<1x128xf32>
    %34 = vector.broadcast %33 : vector<1x128xf32> to vector<16x128xf32>
    %35 = arith.addf %32, %34 : vector<16x128xf32>
    %cst_24 = arith.constant 0.000000e+00 : f32
    %36 = vector.broadcast %cst_24 : f32 to vector<16x128xf32>
    %37 = arith.maximumf %35, %36 : vector<16x128xf32>
    %38 = arith.truncf %37 : vector<16x128xf32> to vector<16x128xbf16>
    %c0_25 = arith.constant 0 : index
    %c0_26 = arith.constant 0 : index
    %39 = vector.load %arg10[%c0_25, %c0_26] : memref<128x64xbf16, #tpu.memory_space<vmem>>, vector<128x64xbf16>
    %cst_27 = arith.constant dense<0.000000e+00> : vector<16x64xf32>
    %40 = tpu.matmul %38, %39, %cst_27 {dimension_numbers = #tpu.dot_dimension_numbers<[1], [0], [0], [1], [0, 0, 1, 1], [], []>} : vector<16x128xbf16>, vector<128x64xbf16>, vector<16x64xf32> -> vector<16x64xf32>
    %c0_28 = arith.constant 0 : index
    %c0_29 = arith.constant 0 : index
    %41 = vector.load %arg11[%c0_28, %c0_29] : memref<1x64xf32, #tpu.memory_space<vmem>>, vector<1x64xf32>
    %42 = vector.broadcast %41 : vector<1x64xf32> to vector<16x64xf32>
    %43 = arith.addf %40, %42 : vector<16x64xf32>
    %cst_30 = arith.constant 0.000000e+00 : f32
    %44 = vector.broadcast %cst_30 : f32 to vector<16x64xf32>
    %45 = arith.maximumf %43, %44 : vector<16x64xf32>
    %c0_31 = arith.constant 0 : index
    %c0_32 = arith.constant 0 : index
    %46 = vector.load %arg12[%c0_31, %c0_32] : memref<1x64xf32, #tpu.memory_space<vmem>>, vector<1x64xf32>
    %47 = vector.broadcast %46 : vector<1x64xf32> to vector<16x64xf32>
    %48 = arith.mulf %45, %47 : vector<16x64xf32>
    %cst_33 = arith.constant dense<0.000000e+00> : vector<16xf32>
    %49 = vector.multi_reduction <add>, %48, %cst_33 [1] : vector<16x64xf32> to vector<16xf32>
    %50 = vector.shape_cast %49 : vector<16xf32> to vector<16x1xf32>
    %c0_34 = arith.constant 0 : index
    %c0_35 = arith.constant 0 : index
    %51 = vector.load %arg13[%c0_34, %c0_35] : memref<1x1xf32, #tpu.memory_space<vmem>>, vector<1x1xf32>
    %52 = vector.broadcast %51 : vector<1x1xf32> to vector<16x1xf32>
    %53 = arith.addf %50, %52 : vector<16x1xf32>
    %c0_36 = arith.constant 0 : index
    %c0_37 = arith.constant 0 : index
    %54 = vector.load %arg14[%c0_36, %c0_37] : memref<16x1xf32, #tpu.memory_space<vmem>>, vector<16x1xf32>
    tpu.vector_store %arg14[%c0_36, %c0_37], %53 {strides = array<i32>} : memref<16x1xf32, #tpu.memory_space<vmem>>, vector<16x1xf32>,
    return
  }
  func.func @transform_0(%arg0: i32) -> (i32, i32) {
    %c0_i32 = arith.constant 0 : i32
    %c0_i32_0 = arith.constant 0 : i32
    return %arg0, %c0_i32 : i32, i32
  }
  func.func @transform_1(%arg0: i32) -> (i32, i32) {
    %c0_i32 = arith.constant 0 : i32
    %c0_i32_0 = arith.constant 0 : i32
    return %arg0, %c0_i32 : i32, i32
  }
  func.func @transform_2(%arg0: i32) -> (i32, i32) {
    %c0_i32 = arith.constant 0 : i32
    %c0_i32_0 = arith.constant 0 : i32
    return %arg0, %c0_i32 : i32, i32
  }
  func.func @transform_3(%arg0: i32) -> (i32, i32) {
    %c0_i32 = arith.constant 0 : i32
    %c0_i32_0 = arith.constant 0 : i32
    return %arg0, %c0_i32 : i32, i32
  }
  func.func @transform_4(%arg0: i32) -> (i32, i32) {
    %c0_i32 = arith.constant 0 : i32
    %c0_i32_0 = arith.constant 0 : i32
    %c0_i32_1 = arith.constant 0 : i32
    return %c0_i32, %c0_i32_0 : i32, i32
  }
  func.func @transform_5(%arg0: i32) -> (i32, i32) {
    %c0_i32 = arith.constant 0 : i32
    %c0_i32_0 = arith.constant 0 : i32
    %c0_i32_1 = arith.constant 0 : i32
    return %c0_i32, %c0_i32_0 : i32, i32
  }
  func.func @transform_6(%arg0: i32) -> (i32, i32) {
    %c0_i32 = arith.constant 0 : i32
    %c0_i32_0 = arith.constant 0 : i32
    %c0_i32_1 = arith.constant 0 : i32
    return %c0_i32, %c0_i32_0 : i32, i32
  }
  func.func @transform_7(%arg0: i32) -> (i32, i32) {
    %c0_i32 = arith.constant 0 : i32
    %c0_i32_0 = arith.constant 0 : i32
    %c0_i32_1 = arith.constant 0 : i32
    return %c0_i32, %c0_i32_0 : i32, i32
  }
  func.func @transform_8(%arg0: i32) -> (i32, i32) {
    %c0_i32 = arith.constant 0 : i32
    %c0_i32_0 = arith.constant 0 : i32
    %c0_i32_1 = arith.constant 0 : i32
    return %c0_i32, %c0_i32_0 : i32, i32
  }
  func.func @transform_9(%arg0: i32) -> (i32, i32) {
    %c0_i32 = arith.constant 0 : i32
    %c0_i32_0 = arith.constant 0 : i32
    %c0_i32_1 = arith.constant 0 : i32
    return %c0_i32, %c0_i32_0 : i32, i32
  }
  func.func @transform_10(%arg0: i32) -> (i32, i32) {
    %c0_i32 = arith.constant 0 : i32
    %c0_i32_0 = arith.constant 0 : i32
    %c0_i32_1 = arith.constant 0 : i32
    return %c0_i32, %c0_i32_0 : i32, i32
  }
  func.func @transform_11(%arg0: i32) -> (i32, i32) {
    %c0_i32 = arith.constant 0 : i32
    %c0_i32_0 = arith.constant 0 : i32
    %c0_i32_1 = arith.constant 0 : i32
    return %c0_i32, %c0_i32_0 : i32, i32
  }
  func.func @transform_12(%arg0: i32) -> (i32, i32) {
    %c0_i32 = arith.constant 0 : i32
    %c0_i32_0 = arith.constant 0 : i32
    %c0_i32_1 = arith.constant 0 : i32
    return %c0_i32, %c0_i32_0 : i32, i32
  }
  func.func @transform_13(%arg0: i32) -> (i32, i32) {
    %c0_i32 = arith.constant 0 : i32
    %c0_i32_0 = arith.constant 0 : i32
    return %arg0, %c0_i32 : i32, i32
  }
}

</mosaic_0001>

<bundles_post_ra>
// kernel: tpu_custom_call.1
= control target key start
LH: loop header
LB: loop body
LE: loop exit
PB: predicated region body
PF: predicated region fallthrough
CT: control target
= control target key end

     0   :  { %s1135_s0 = inlined_call_operand.hbm [shape: f32[13,200], index: 0, kind: input, shape index: {}]   ;;  %s1136_s1 = inlined_call_operand.vmem [shape: f32[13,36], index: 1, kind: input, shape index: {}]   ;;  %s1137_s2 = inlined_call_operand.vmem [shape: s32[13,1], index: 2, kind: input, shape index: {}]   ;;  %s1138_s3 = inlined_call_operand.vmem [shape: s32[13,1], index: 3, kind: input, shape index: {}]   ;;  %s1139_s4 = inlined_call_operand.vmem [shape: bf16[200,128], index: 4, kind: input, shape index: {}]   ;;  %s1140_s5 = inlined_call_operand.hbm [shape: bf16[36,128], index: 5, kind: input, shape index: {}]   ;;  %s1141_s6 = inlined_call_operand.hbm [shape: bf16[16,128], index: 6, kind: input, shape index: {}]   ;;  %s1142_s7 = inlined_call_operand.hbm [shape: bf16[24,128], index: 7, kind: input, shape index: {}]   ;;  %s1143_s8 = inlined_call_operand.hbm [shape: f32[1,128], index: 8, kind: input, shape index: {}]   ;;  %s1144_s9 = inlined_call_operand.vmem [shape: bf16[128,64], index: 9, kind: input, shape index: {}]   ;;  %s1145_s10 = inlined_call_operand.vmem [shape: f32[1,64], index: 10, kind: input, shape index: {}]   ;;  %s1146_s11 = inlined_call_operand.vmem [shape: f32[1,64], index: 11, kind: input, shape index: {}]   ;;  %s1147_s12 = inlined_call_operand.<no memory space> [shape: f32[1,1], index: 12, kind: input, shape index: {}]   ;;  %s1148_s13 = inlined_call_operand.vmem [shape: f32[13,1], index: 13, kind: output, shape index: {}]  }
   0x1   :  { %v18_v0 = vstv %s1147_s12 }
   0x2   :  { %19 = vst [vmem:[#allocation2] sm:$0x1] %v18_v0 }
   0x3   :  { %20 = vsyncpa [#allocation4], 0 }
   0x4   :  { %21 = vsyncpa [#allocation6], 0 }
   0x5   :  { %22 = vsyncpa [#allocation9], 0  ;;  %s890_s27 = smov [#allocation5]  }
   0x6   :  { %s48_s28 = sshll.u32 %s890_s27, 4  ;;  %s49_s28 = int_to_ptr.vmem [resolvable:$true] %s48_s28 }
   0x7   :  { %s792_s29 = scalar_lea.vmem %s49_s28, 320  ;;  %p797_p1 = scmp.lt.s32.totalorder %s49_s28, %s49_s28 }
   0x8   :  { %p793_p0 = scmp.ne.s32.totalorder %s49_s28, %s792_s29  ;;  %p798_p2 = scmp.lt.s32.totalorder %s792_s29, %s792_s29 }
   0xa   :  { %p799_p3 = por %p798_p2, %p797_p1 }
   0xc   :  { %p800_p4 = pnand %p799_p3, %p793_p0 }
   0xe   :  { %803 = shalt.err (!%p800_p4)
}
   0xf   :  { %s891_s30 = smov 64   ;;  %s892_s14 = smov 4  }
  0x10   :  { %54 = dma.hbm_to_vmem [thread:$0]  %s1140_s5, 320, %s49_s28, [#allocation6], %s891_s30, %s891_s30, %s892_s14  }
  0x11   :  { %s893_s16 = smov [#allocation8]   ;;  %s894_s18 = smov [#allocation3]  }
  0x12   :  { %s72_s17 = sshll.u32 %s893_s16, 4  ;;  %s28_s19 = sshll.u32 %s894_s18, 4  ;;  %s73_s17 = int_to_ptr.vmem [resolvable:$true] %s72_s17  ;;  %s29_s19 = int_to_ptr.vmem [resolvable:$true] %s28_s19 }
  0x13   :  { %s812_s20 = scalar_lea.vmem %s73_s17, 192  ;;  %p817_p6 = scmp.lt.s32.totalorder %s73_s17, %s73_s17 }
  0x14   :  { %p813_p5 = scmp.ne.s32.totalorder %s73_s17, %s812_s20  ;;  %p818_p7 = scmp.lt.s32.totalorder %s812_s20, %s812_s20 }
  0x16   :  { %p819_p8 = por %p818_p7, %p817_p6 }
  0x18   :  { %p820_p9 = pnand %p819_p8, %p813_p5 }
  0x1a   :  { %823 = shalt.err (!%p820_p9)
}
  0x1b   :  { %78 = dma.hbm_to_vmem [thread:$0]  %s1142_s7, 192, %s73_s17, [#allocation9], %s891_s30, %s891_s30, %s892_s14  }
  0x1c   :  { %s832_s5 = scalar_lea.vmem %s29_s19, 512  ;;  %p837_p11 = scmp.lt.s32.totalorder %s29_s19, %s29_s19 }
  0x1d   :  { %p833_p10 = scmp.ne.s32.totalorder %s29_s19, %s832_s5  ;;  %p838_p12 = scmp.lt.s32.totalorder %s832_s5, %s832_s5 }
  0x1f   :  { %p839_p13 = por %p838_p12, %p837_p11 }
  0x21   :  { %p840_p0 = pnand %p839_p13, %p833_p10 }
  0x23   :  { %843 = shalt.err (!%p840_p0)
}
  0x24   :  { %s895_s23 = smov 256   ;;  %s896_s24 = smov 16  }
  0x25   :  { %34 = dma.hbm_to_vmem [thread:$0]  %s1135_s0, 512, %s29_s19, [#allocation4], %s895_s23, %s895_s23, %s896_s24  }
  0x26   :  { %s897_s27 = smov [#allocation7]   ;;  %s898_s29 = smov [#allocation10]  }
  0x27   :  { %s60_s28 = sshll.u32 %s897_s27, 4  ;;  %s85_s12 = sshll.u32 %s898_s29, 4  ;;  %s61_s28 = int_to_ptr.vmem [resolvable:$true] %s60_s28  ;;  %s86_s12 = int_to_ptr.vmem [resolvable:$true] %s85_s12 }
  0x28   :  { %s852_s7 = scalar_lea.vmem %s61_s28, 128  ;;  %p857_p2 = scmp.lt.s32.totalorder %s61_s28, %s61_s28 }
  0x29   :  { %p853_p1 = scmp.ne.s32.totalorder %s61_s28, %s852_s7  ;;  %p858_p3 = scmp.lt.s32.totalorder %s852_s7, %s852_s7 }
  0x2b   :  { %p859_p4 = por %p858_p3, %p857_p2 }
  0x2d   :  { %p860_p5 = pnand %p859_p4, %p853_p1 }
  0x2f   :  { %863 = shalt.err (!%p860_p5)
}
  0x30   :  { %66 = dma.hbm_to_vmem [thread:$0]  %s1141_s6, 128, %s61_s28, [#allocation6], %s891_s30, %s891_s30, %s892_s14  }
  0x31   :  { %s872_s0 = scalar_lea.vmem %s86_s12, 16  ;;  %s876_s17 = scalar_lea.vmem %s86_s12, 32 }
  0x32   :  { %p873_p6 = scmp.ne.s32.totalorder %s86_s12, %s872_s0  ;;  %p877_p7 = scmp.lt.s32.totalorder %s86_s12, %s86_s12 }
  0x33   :  { %p878_p8 = scmp.lt.s32.totalorder %s876_s17, %s872_s0 }
  0x35   :  { %p879_p9 = por %p878_p8, %p877_p7 }
  0x37   :  { %p880_p10 = pnand %p879_p9, %p873_p6 }
  0x39   :  { %883 = shalt.err (!%p880_p10)
}
  0x3a   :  { %88 = dma.hbm_to_vmem [thread:$0]  %s1143_s8, 16, %s86_s12, [#allocation9]  }
  0x3b   :  { %884 = dma.done.wait [#allocation4], 512  }
  0x3c   :  { %885 = vsyncadd [#allocation4], 4294966784 }
  0x3d   :  { %886 = dma.done.wait [#allocation6], 448  }
  0x3e   :  { %887 = vsyncadd [#allocation6], 4294966848 }
  0x3f   :  { %888 = dma.done.wait [#allocation9], 208  }
  0x40   :  { %889 = vsyncadd [#allocation9], 4294967088  ;;  %v899_v1 = vmov 0   ;;  %v900_v2 = vmov 0.0   ;;  %vm901_vm0 = vmmov 0   ;;  %v340_v3 = vld [vmem:[%s1137_s2] sm:$0xff]  ;;  %v342_v35 = vlaneseq }
  0x41   :  { %755 = vset.pattern.permute.xlu0 %v899_v1  ;;  %756 = vset.pattern.permute.xlu1 %v899_v1  ;;  %v410_v4 = vld [vmem:[%s1138_s3] sm:$0xff]  ;;  %v341_v5 = vld [vmem:[%s1137_s2 + $0x8] sm:$0xff]  ;;  %v757_v7 = vld [vmem:[%s1139_s4 + $0x38] sm:$0xff]   ;;  %vm171_vm1 = vcmask 1041408   ;;  %vm291_vm2 = vcmask 588800   ;;  %vm167_vm3 = vcmask 293888  }
  0x42   :  { %299 = vmatprep.subr.bf16.mxu1 %v899_v1  ;;  %699 = vmatprep.subr.bf16.mxu0 %v900_v2  ;;  %v411_v6 = vld [vmem:[%s1138_s3 + $0x8] sm:$0xff]  ;;  %v758_v8 = vld [vmem:[%s1139_s4 + $0x30] sm:$0xff]   ;;  %v760_v11 = vld [vmem:[%s1139_s4 + $0x20] sm:$0xff]   ;;  %vm295_vm4 = vcmask 1043456   ;;  %v343_v36 = vand.u32 127, %v342_v35  ;;  %vm363_vm7 = vcmask 130048  }
  0x43   :  { %705 = vmatprep.mubr.msk.bf16.mxu0 %vm901_vm0, %v900_v2  ;;  %345 = vperm.xlu0 %755, %v340_v3   ;;  %v759_v9 = vld [vmem:[%s1139_s4 + $0x28] sm:$0xff]   ;;  %v767_v10 = vld [vmem:[#allocation5 + $0x10] ss:$0 sps:$4 sm:$0x33]   ;;  %v761_v14 = vld [vmem:[%s1139_s4 + $0x18] sm:$0xff]   ;;  %vm435_vm10 = vcmask 195584  }
  0x44   :  { %413 = vperm.xlu1 %756, %v410_v4   ;;  %300 = vmatpush1.bf16.msra.mxu1 %v757_v7  ;;  %v173_v12 = vsel %vm171_vm1, %v767_v10, 0  ;;  %v769_v13 = vld [vmem:[#allocation5 + $0x8] sm:$0xff]   ;;  %v771_v15 = vld [vmem:[#allocation5] sm:$0xff]   ;;  %v116_v19 = vld [vmem:[#allocation3 + $0x18] sm:$0xff]  ;;  %vm620_vm11 = vcmask 523264   ;;  %vm636_vm12 = vcmask 7168  }
  0x45   :  { %301 = vmatprep.subr.bf16.mxu1 %v899_v1  ;;  %700 = vmatpush3.bf16.msra.mxu0 %v173_v12  ;;  %v114_v16 = vld [vmem:[#allocation3 + $0x8] sm:$0xff]  ;;  %v144_v17 = vld [vmem:[%s1136_s1] sm:$0xff]  ;;  %v773_v24 = vld [vmem:[#allocation7] sm:$0xff]  }
  0x46   :  { %701 = vmatprep.subr.bf16.mxu0 %v900_v2  ;;  %v145_v18 = vld [vmem:[%s1136_s1 + $0x8] sm:$0xff]  ;;  %v118_v20 = vpack.c.bf16 %v116_v19, %v114_v16  ;;  %v762_v21 = vld [vmem:[%s1139_s4 + $0x10] sm:$0xff]   ;;  %v764_v25 = vld [vmem:[%s1139_s4] sm:$0xff]  }
  0x47   :  { %348 = vperm.xlu0 %755, %v341_v5   ;;  %v146_v22 = vpack.c.bf16 %v145_v18, %v144_v17  ;;  %v763_v23 = vld [vmem:[%s1139_s4 + $0x8] sm:$0xff]   ;;  %v765_v26 = vld [vmem:[%s1139_s4 + $0x60] ss:$0 sps:$4 sm:$0xff]   ;;  %v766_v28 = vld [vmem:[%s1139_s4 + $0x58] sm:$0xff]  }
  0x48   :  { %416 = vperm.xlu1 %756, %v411_v6   ;;  %302 = vmatpush1.bf16.msra.mxu1 %v758_v8  ;;  %v297_v27 = vsel %vm295_vm4, %v765_v26, 0  ;;  %v768_v29 = vld [vmem:[%s1139_s4 + $0x50] sm:$0xff]   ;;  %v770_v30 = vld [vmem:[%s1139_s4 + $0x48] sm:$0xff]   ;;  %v772_v31 = vld [vmem:[%s1139_s4 + $0x40] sm:$0xff]  }
  0x49   :  { %303 = vmatprep.subr.bf16.mxu1 %v899_v1  ;;  %702 = vmatpush3.bf16.msra.mxu0 %v769_v13  ;;  %v113_v32 = vld [vmem:[#allocation3] sm:$0xff]  ;;  %v115_v33 = vld [vmem:[#allocation3 + $0x10] sm:$0xff]  ;;  %v679_v26 = vld [vmem:[%s1146_s11] ss:$0 sm:$0xff] }
  0x4a   :  { %703 = vmatprep.subr.bf16.mxu0 %v900_v2  ;;  %663 = vmatprep.mubr.msk.bf16.mxu1 %vm291_vm2, %v118_v20  ;;  %v117_v34 = vpack.c.bf16 %v115_v33, %v113_v32  ;;  %v774_v39 = vld [vmem:[#allocation8 + $0x8] ss:$0 sps:$4 sm:$0xff]   ;;  %v775_v46 = vld [vmem:[#allocation8] sm:$0xff]   ;;  %v777_v51 = vld [vmem:[%s1144_s9 + $0x30] sm:$0xff]  }
  0x4b   :  { %v440_v45 = vsel %vm295_vm4, %v774_v39, 0  ;;  %v776_v49 = vld [vmem:[%s1144_s9 + $0x38] sm:$0xff]   ;;  %v778_v52 = vld [vmem:[%s1144_s9 + $0x28] sm:$0xff]   ;;  %v779_v53 = vld [vmem:[%s1144_s9 + $0x20] sm:$0xff]  }
  0x4c   :  { %304 = vmatpush1.bf16.msra.mxu1 %v759_v9  ;;  %v780_v54 = vld [vmem:[%s1144_s9 + $0x18] sm:$0xff]   ;;  %v781_v55 = vld [vmem:[%s1144_s9 + $0x10] sm:$0xff]   ;;  %v782_v56 = vld [vmem:[%s1144_s9 + $0x8] sm:$0xff]  }
  0x4d   :  { %305 = vmatprep.subr.bf16.mxu1 %v899_v1  ;;  %704 = vmatpush3.bf16.msra.mxu0 %v771_v15  ;;  %v783_v57 = vld [vmem:[%s1144_s9] sm:$0xff]  }
  0x4e   :  { %709 = vmatprep.subr.bf16.mxu0 %v900_v2 }
  0x50   :  { %306 = vmatpush1.bf16.msra.mxu1 %v760_v11  ;;  %706 = vmatmul.mubr.msk.bf16.vlgmr.msra.gmra.mxu0 %vm167_vm3, %v146_v22  ;;  %v669_v11 = vld [vmem:[#allocation10] ss:$0 sm:$0xff]  ;;  %v670_v22 = vld [vmem:[%s1145_s10] ss:$0 sm:$0xff] }
  0x51   :  { %307 = vmatprep.subr.bf16.mxu1 %v899_v1  ;;  %710 = vmatpush3.bf16.msra.mxu0 %v773_v24 }
  0x52   :  { %711 = vmatprep.mubr.msk.bf16.mxu0 %vm901_vm0, %v900_v2  ;;  %715 = vmatprep.subr.bf16.mxu0 %v900_v2 }
  0x54   :  { %308 = vmatpush1.bf16.msra.mxu1 %v761_v14 }
  0x55   :  { %309 = vmatprep.subr.bf16.mxu1 %v899_v1 }
  0x58   :  { %310 = vmatpush1.bf16.msra.mxu1 %v762_v21 }
  0x59   :  { %311 = vmatprep.subr.bf16.mxu1 %v899_v1 }
  0x5c   :  { %312 = vmatpush1.bf16.msra.mxu1 %v763_v23 }
  0x5d   :  { %313 = vmatprep.subr.bf16.mxu1 %v899_v1 }
  0x60   :  { %314 = vmatpush1.bf16.msra.mxu1 %v764_v25 }
  0x61   :  { %321 = vmatprep.subr.bf16.mxu1 %v899_v1 }
  0x64   :  { %322 = vmatpush2.bf16.msra.mxu1 %v297_v27 }
  0x65   :  { %323 = vmatprep.subr.bf16.mxu1 %v899_v1 }
  0x68   :  { %324 = vmatpush2.bf16.msra.mxu1 %v766_v28 }
  0x69   :  { %325 = vmatprep.subr.bf16.mxu1 %v899_v1 }
  0x6c   :  { %326 = vmatpush2.bf16.msra.mxu1 %v768_v29 }
  0x6d   :  { %327 = vmatprep.subr.bf16.mxu1 %v899_v1 }
  0x70   :  { %328 = vmatpush2.bf16.msra.mxu1 %v770_v30 }
  0x71   :  { %329 = vmatprep.subr.bf16.mxu1 %v899_v1 }
  0x74   :  { %330 = vmatpush2.bf16.msra.mxu1 %v772_v31 }
  0x77   :  { %332 = vmatmul.mubr.bf16.vlgmr.msra.gmra.mxu1 %v117_v34 }
  0xbe   :  { %v346_v37 = vpop.permute.xlu0 %345 }
  0xbf   :  { %v414_v38 = vpop.permute.xlu1 %413  ;;  %vm350_vm5 = vcmp.eq.s32.totalorder %v346_v37, %v343_v36 }
  0xc0   :  { %v352_v41 = vsel %vm350_vm5, 1.0, %v900_v2  ;;  %vm418_vm8 = vcmp.eq.s32.totalorder %v414_v38, %v343_v36 }
  0xc1   :  { %v420_v47 = vsel %vm418_vm8, 1.0, %v900_v2 }
  0xc2   :  { %v349_v40 = vpop.permute.xlu0 %348 }
  0xc3   :  { %vm351_vm6 = vcmp.eq.s32.totalorder %v349_v40, %v343_v36  ;;  %v417_v43 = vpop.permute.xlu1 %416 }
  0xc4   :  { %v353_v42 = vsel %vm351_vm6, 1.0, %v900_v2  ;;  %vm419_vm9 = vcmp.eq.s32.totalorder %v417_v43, %v343_v36  ;;  %v680_v36 = vld [vmem:[#allocation2] ss:$0 sm:$0xff] }
  0xc5   :  { %v354_v44 = vpack.c.bf16 %v353_v42, %v352_v41  ;;  %v421_v48 = vsel %vm419_vm9, 1.0, %v900_v2 }
  0xc6   :  { %v422_v50 = vpack.c.bf16 %v421_v48, %v420_v47 }
  0xc7   :  { %712 = vmatmul.mubr.msk.bf16.vlgmr.msra.gmra.mxu0 %vm363_vm7, %v354_v44 }
  0xc8   :  { %716 = vmatpush3.bf16.msra.mxu0 %v440_v45  ;;  %719 = vmatprep.mubr.msk.bf16.mxu0 %vm901_vm0, %v900_v2 }
  0xc9   :  { %717 = vmatprep.subr.bf16.mxu0 %v900_v2 }
  0xcc   :  { %718 = vmatpush3.bf16.msra.mxu0 %v775_v46 }
  0xcd   :  { %723 = vmatprep.subr.bf16.mxu0 %v900_v2 }
  0xcf   :  { %720 = vmatmul.mubr.msk.bf16.vlgmr.msra.gmra.mxu0 %vm435_vm10, %v422_v50 }
  0xd0   :  { %724 = vmatpush3.bf16.msra.mxu0 %v776_v49  ;;  %739 = vmatprep.mubr.msk.bf16.mxu0 %vm901_vm0, %v900_v2 }
  0xd1   :  { %725 = vmatprep.subr.bf16.mxu0 %v900_v2 }
  0xd4   :  { %726 = vmatpush3.bf16.msra.mxu0 %v777_v51 }
  0xd5   :  { %727 = vmatprep.subr.bf16.mxu0 %v900_v2 }
  0xd8   :  { %728 = vmatpush3.bf16.msra.mxu0 %v778_v52 }
  0xd9   :  { %729 = vmatprep.subr.bf16.mxu0 %v900_v2 }
  0xdc   :  { %730 = vmatpush3.bf16.msra.mxu0 %v779_v53 }
  0xdd   :  { %731 = vmatprep.subr.bf16.mxu0 %v900_v2 }
  0xe0   :  { %732 = vmatpush3.bf16.msra.mxu0 %v780_v54 }
  0xe1   :  { %733 = vmatprep.subr.bf16.mxu0 %v900_v2 }
  0xe4   :  { %734 = vmatpush3.bf16.msra.mxu0 %v781_v55 }
  0xe5   :  { %735 = vmatprep.subr.bf16.mxu0 %v900_v2 }
  0xe8   :  { %736 = vmatpush3.bf16.msra.mxu0 %v782_v56 }
  0xe9   :  { %737 = vmatprep.subr.bf16.mxu0 %v900_v2 }
  0xec   :  { %738 = vmatpush3.bf16.msra.mxu0 %v783_v57 }
 0x110   :  { %v209_v58 = vpop.f32.mrf.mxu0 }
 0x112   :  { %v707_v59 = vpop.f32.mrf.mxu0 }
 0x114   :  { %v212_v60 = vpop.f32.mrf.mxu0 }
 0x116   :  { %v708_v61 = vpop.f32.mrf.mxu0 }
 0x137   :  { %v333_v62 = vpop.f32.mrf.mxu1 }
 0x138   :  { %v334_v63 = vadd.f32 %v333_v62, %v209_v58 }
 0x139   :  { %v335_v0 = vpop.f32.mrf.mxu1 }
 0x13b   :  { %v336_v1 = vpop.f32.mrf.mxu1 }
 0x13c   :  { %v337_v3 = vadd.f32 %v336_v1, %v212_v60 }
 0x13d   :  { %v338_v4 = vpop.f32.mrf.mxu1 }
 0x187   :  { %v401_v5 = vpop.f32.mrf.mxu0 }
 0x188   :  { %v408_v2 = vadd.f32 %v401_v5, %v334_v63 }
 0x189   :  { %v713_v6 = vpop.f32.mrf.mxu0 }
 0x18b   :  { %v404_v7 = vpop.f32.mrf.mxu0 }
 0x18c   :  { %v409_v13 = vadd.f32 %v404_v7, %v337_v3 }
 0x18d   :  { %v714_v8 = vpop.f32.mrf.mxu0 }
 0x18f   :  { %v476_v9 = vpop.f32.mrf.mxu0 }
 0x190   :  { %v483_v10 = vadd.f32 %v476_v9, %v408_v2 }
 0x191   :  { %v721_v12 = vpop.f32.mrf.mxu0 }
 0x192   :  { %v492_v15 = vadd.f32 %v669_v11, %v483_v10 }
 0x193   :  { %v479_v14 = vpop.f32.mrf.mxu0 }
 0x194   :  { %v484_v16 = vadd.f32 %v479_v14, %v409_v13  ;;  %v494_v19 = vmax.f32 %v492_v15, 0.0 }
 0x195   :  { %v722_v17 = vpop.f32.mrf.mxu0 }
 0x196   :  { %v493_v18 = vadd.f32 %v669_v11, %v484_v16 }
 0x198   :  { %v495_v20 = vmax.f32 %v493_v18, 0.0 }
 0x19a   :  { %v496_v21 = vpack.c.bf16 %v495_v20, %v494_v19 }
 0x19c   :  { %740 = vmatmul.mubr.bf16.vlgmr.msra.gmra.mxu0 %v496_v21 }
 0x25c   :  { %v602_v23 = vpop.f32.mrf.mxu0 }
 0x25d   :  { %v603_v24 = vadd.f32 %v670_v22, %v602_v23 }
 0x25e   :  { %v741_v25 = vpop.f32.mrf.mxu0 }
 0x25f   :  { %v609_v27 = vmax.f32 %v603_v24, 0.0 }
 0x260   :  { %v605_v28 = vpop.f32.mrf.mxu0 }
 0x261   :  { %v606_v29 = vadd.f32 %v670_v22, %v605_v28  ;;  %v618_v30 = vmul.f32 %v679_v26, %v609_v27 }
 0x262   :  { %v742_v31 = vpop.f32.mrf.mxu0 }
 0x263   :  { %v610_v32 = vmax.f32 %v606_v29, 0.0  ;;  %v621_v33 = vsel %vm620_vm11, %v618_v30, 0.0 }
 0x264   :  { %622 = vadd.xlane.f32.xlu0 %v621_v33 }
 0x265   :  { %v619_v34 = vmul.f32 %v679_v26, %v610_v32 }
 0x267   :  { %v624_v35 = vsel %vm620_vm11, %v619_v34, 0.0 }
 0x268   :  { %625 = vadd.xlane.f32.xlu1 %v624_v35 }
 0x2ed   :  { %v623_v37 = vpop.xlane.xlu0 %622 }
 0x2ee   :  { %v634_v38 = vadd.f32 %v680_v36, %v623_v37 }
 0x2f0   :  { %637 = vst.msk [vmem:[%s1148_s13] sm:$0xff] %vm636_vm12, %v634_v38 }
 0x2f1   :  { %v626_v39 = vpop.xlane.xlu1 %625 }
 0x2f2   :  { %v635_v40 = vadd.f32 %v680_v36, %v626_v39 }
 0x2f4   :  { %638 = vst.msk [vmem:[%s1148_s13 + $0x8] sm:$0xff] %vm636_vm12, %v635_v40 }
 0x2f5   :  { %643 = vsyncpa [#allocation4], 1 }
 0x2f6   :  { %644 = vsyncpa [#allocation6], 1 }
 0x2f7   :  { %645 = vsyncpa [#allocation9], 1 }

</bundles_post_ra>
